<compile_context>
chip_gen: v6e
topology: v6e:2x2x1
jax: 0.10.0
libtpu: 0.0.40
codegen_flags: <defaults>
</compile_context>

<pallas_src>
import functools
import math

import jax
import jax.numpy as jnp
from jax.experimental import pallas as pl
from jax.experimental.pallas import tpu as pltpu

_LANES = 128
# 8192x128 f32 block = 4 MiB -> <=16 MiB live (in+out, double buffered).
_MAX_TILE_ROWS = 8192
# 32 MiB: above v5e's 16 MiB scoped default, below v7x's 32 MiB scoped / 64 MiB
# physical VMEM.  (Kept as one constant since the tile size is shared too.)
_VMEM_LIMIT_BYTES = 32 * 1024 * 1024
# Leading "parallel" grid axis for the min/max reduction: lets v7x's two
# TensorCores each reduce half the slab.  On 1-TC chips it is just a 2-step
# sequential loop over per-core partials (negligible overhead).
_CORE_SPLIT = 2


# ---------------------------------------------------------------------------
# Slab helpers (zero-copy for the common numel % 128 == 0 case)
# ---------------------------------------------------------------------------
def _to_slab(x):
    """Lane-dense (rows, 128) view of x. Zero-copy reshape when x.size % 128
    == 0; otherwise pads with zeros to the next multiple of 128 (one copy)."""
    flat = x.reshape(-1)
    n = flat.shape[0]
    rem = n % _LANES
    if rem:
        flat = jnp.concatenate([flat, jnp.zeros((_LANES - rem,), flat.dtype)])
    return flat.reshape(-1, _LANES), n


def _from_slab(out2d, n, shape):
    if out2d.size == n:
        return out2d.reshape(shape)                    # zero-copy
    return out2d.reshape(-1)[:n].reshape(shape)        # rare unaligned tail


def _tile_rows(rows):
    return min(_MAX_TILE_ROWS, rows)


# ---------------------------------------------------------------------------
# Kernel 1: global min / max reduction (batch-init of s, beta).
# grid = (core_split "parallel", row tiles "arbitrary").
# The (8,128) output block for core c stays resident across the inner axis and
# is used directly as the fp32 accumulator (no scratch, no per-tile XLU).
# Validity masking runs only on the single ragged block, via pl.when.
# ---------------------------------------------------------------------------
def _minmax_kernel(x_ref, min_ref, max_ref, *, blocks_per_core, total_blocks,
                   valid_in_last, tile_rows, needs_mask):
    c = pl.program_id(0)
    i = pl.program_id(1)

    @pl.when(i == 0)
    def _():
        min_ref[...] = jnp.full_like(min_ref, jnp.inf)
        max_ref[...] = jnp.full_like(max_ref, -jnp.inf)

    x = x_ref[...].astype(jnp.float32)

    def accumulate(x_min, x_max):
        if tile_rows % 8 == 0:
            # (tr,128) -> (tr/8, 8, 128); reduce over leading axis is pure
            # VALU (vreg-wise min/max), no cross-sublane XLU in the hot loop.
            t_min = x_min.reshape(tile_rows // 8, 8, _LANES).min(axis=0)
            t_max = x_max.reshape(tile_rows // 8, 8, _LANES).max(axis=0)
        else:  # tiny slabs (rows < 8): single block, broadcast into (8,128)
            t_min = jnp.min(x_min, axis=0, keepdims=True)
            t_max = jnp.max(x_max, axis=0, keepdims=True)
        min_ref[...] = jnp.minimum(min_ref[...], t_min)
        max_ref[...] = jnp.maximum(max_ref[...], t_max)

    if needs_mask:
        blk = jnp.minimum(c * blocks_per_core + i, total_blocks - 1)
        is_ragged = blk == total_blocks - 1

        @pl.when(jnp.logical_not(is_ragged))
        def _():
            accumulate(x, x)          # mask-free fast path for full tiles

        @pl.when(is_ragged)
        def _():
            flat_idx = (jax.lax.broadcasted_iota(jnp.int32, x.shape, 0) * _LANES
                        + jax.lax.broadcasted_iota(jnp.int32, x.shape, 1))
            valid = flat_idx < valid_in_last
            accumulate(jnp.where(valid, x, jnp.inf),
                       jnp.where(valid, x, -jnp.inf))
    else:
        accumulate(x, x)


def _minmax_slab(x2d, n):
    rows = x2d.shape[0]
    tr = _tile_rows(rows)
    total_blocks = pl.cdiv(rows, tr)
    bpc = pl.cdiv(total_blocks, _CORE_SPLIT)
    needs_mask = (n % (tr * _LANES)) != 0
    valid_in_last = n - (total_blocks - 1) * tr * _LANES

    mn, mx = pl.pallas_call(
        functools.partial(
            _minmax_kernel, blocks_per_core=bpc, total_blocks=total_blocks,
            valid_in_last=valid_in_last, tile_rows=tr, needs_mask=needs_mask),
        grid=(_CORE_SPLIT, bpc),
        in_specs=[pl.BlockSpec(
            (tr, _LANES),
            lambda c, i: (jnp.minimum(c * bpc + i, total_blocks - 1), 0))],
        out_specs=(
            pl.BlockSpec((8, _LANES), lambda c, i: (c, 0)),
            pl.BlockSpec((8, _LANES), lambda c, i: (c, 0)),
        ),
        out_shape=(
            jax.ShapeDtypeStruct((_CORE_SPLIT * 8, _LANES), jnp.float32),
            jax.ShapeDtypeStruct((_CORE_SPLIT * 8, _LANES), jnp.float32),
        ),
        compiler_params=pltpu.CompilerParams(
            dimension_semantics=("parallel", "arbitrary"),
            vmem_limit_bytes=_VMEM_LIMIT_BYTES,
        ),
    )(x2d)
    # tiny final combine over (core_split*8, 128) partials
    return jnp.min(mn), jnp.max(mx)


@jax.jit
def minmax_pallas(x):
    x2d, n = _to_slab(x)
    return _minmax_slab(x2d, n)


# ---------------------------------------------------------------------------
# Kernel 2: LSQ+ fake-quantization (ALSQPlus.forward hot path)
#   q  = clamp((x - beta) * inv_s, Qn, Qp)     # inv_s hoisted in wrapper
#   qr = round-half-away-from-zero(q)          # torch "Round"
#   y  = qr * s + beta
# ---------------------------------------------------------------------------
def _lsq_quant_kernel(params_ref, x_ref, o_ref, *, qn, qp):
    s = params_ref[0]
    inv_s = params_ref[1]
    beta = params_ref[2]
    x = x_ref[...].astype(jnp.float32)
    q = jnp.clip((x - beta) * inv_s, qn, qp)
    # half-away-from-zero round with fewer VALU ops than sign*floor(abs+.5)
    nonneg = q >= 0.0
    q_round = jnp.where(nonneg, jnp.floor(q + 0.5), jnp.ceil(q - 0.5))
    o_ref[...] = (q_round * s + beta).astype(o_ref.dtype)


def _quantize_slab(x2d, s, beta, qn, qp):
    rows = x2d.shape[0]
    tr = _tile_rows(rows)
    grid = (pl.cdiv(rows, tr),)
    s32 = jnp.asarray(s, jnp.float32)
    beta32 = jnp.asarray(beta, jnp.float32)
    # NOTE: if a batch is constant, s == 0 and inv_s == inf (same hazard as the
    # original PyTorch repo); kept verbatim for fidelity.
    params = jnp.stack([s32, 1.0 / s32, beta32])  # (3,) f32 in SMEM
    return pl.pallas_call(
        functools.partial(_lsq_quant_kernel, qn=float(qn), qp=float(qp)),
        grid=grid,
        in_specs=[
            pl.BlockSpec(memory_space=pltpu.MemorySpace.SMEM),
            pl.BlockSpec((tr, _LANES), lambda i: (i, 0)),
        ],
        out_specs=pl.BlockSpec((tr, _LANES), lambda i: (i, 0)),
        out_shape=jax.ShapeDtypeStruct(x2d.shape, x2d.dtype),
        compiler_params=pltpu.CompilerParams(
            dimension_semantics=("parallel",),   # megacore auto-split
            vmem_limit_bytes=_VMEM_LIMIT_BYTES,
        ),
    )(params, x2d)


@functools.partial(jax.jit, static_argnames=("qn", "qp"))
def lsqplus_quantize(x, s, beta, qn, qp):
    x2d, n = _to_slab(x)
    q2d = _quantize_slab(x2d, s, beta, qn, qp)
    return _from_slab(q2d, n, x.shape)


# Fused batch-init path: build the slab once, run the min/max reduction, update
# (s, beta) on-device, and quantize with the fresh parameters — all in one jit.
@functools.partial(jax.jit, static_argnames=("qn", "qp", "first_batch"))
def lsqplus_init_and_quantize(x, s_prev, beta_prev, qn, qp, first_batch):
    x2d, n = _to_slab(x)
    mina, maxa = _minmax_slab(x2d, n)
    if first_batch:
        s = (maxa - mina) / (qp - qn)
        beta = mina - s * qn
    else:
        s = s_prev * 0.9 + 0.1 * (maxa - mina) / (qp - qn)
        # NOTE: mirrors the original PyTorch repo (beta EMA anchored on the new
        # s, not on the previous beta) — kept verbatim for fidelity.
        beta = s * 0.9 + 0.1 * (mina - s * qn)
    q2d = _quantize_slab(x2d, s, beta, qn, qp)
    return _from_slab(q2d, n, x.shape), s, beta


# ---------------------------------------------------------------------------
# Module equivalent (parameters initialized exactly like nn.Module.__init__)
# ---------------------------------------------------------------------------
class LSQPlusActivationQuantizer:
    def __init__(self, a_bits, all_positive=False, batch_init=20):
        self.a_bits = a_bits
        self.s_bits = 20
        self.n = 1 << 16
        self.all_positive = all_positive
        self.batch_init = batch_init
        if self.all_positive:
            self.Qn = 0
            self.Qp = 2 ** a_bits - 1
        else:
            self.Qn = -2 ** (a_bits - 1)
            self.Qp = 2 ** (a_bits - 1) - 1
        # deterministic init, same as torch.ones(1).squeeze(0)
        self.s = jnp.float32(1.0)
        self.beta = jnp.float32(1.0)
        self.g = jnp.float32(1.0)
        self.init_state = 0
        self.training = True

    def _update_stats(self, mina, maxa, first):
        qn, qp = self.Qn, self.Qp
        if first:
            self.s = (maxa - mina) / (qp - qn)
            self.beta = mina - self.s * qn
        else:
            self.s = self.s * 0.9 + 0.1 * (maxa - mina) / (qp - qn)
            self.beta = self.s * 0.9 + 0.1 * (mina - self.s * qn)

    def forward(self, activation):
        needs_stats = self.training and self.init_state < self.batch_init
        first = self.training and self.init_state == 0

        if self.training:
            if self.init_state == 0:
                self.g = jnp.float32(
                    1.0 / math.sqrt(activation.size * self.Qp))
            if self.init_state <= self.batch_init:
                self.init_state += 1

        if self.a_bits == 32:
            if needs_stats:
                mina, maxa = minmax_pallas(activation)
                self._update_stats(mina, maxa, first)
            return activation
        if self.a_bits == 1:
            raise AssertionError("Binary quantization is not supported")

        # TODO(synk): only the forward (STE fake-quant) is implemented; the
        # custom backward of ALSQPlus is out of scope for this kernel.
        if needs_stats:
            q, self.s, self.beta = lsqplus_init_and_quantize(
                activation, self.s, self.beta, self.Qn, self.Qp, first)
            return q
        return lsqplus_quantize(activation, self.s, self.beta,
                                self.Qn, self.Qp)

    __call__ = forward


def _reference_forward(x, s, beta, qn, qp):
    q = jnp.clip((x - beta) / s, qn, qp)
    qr = jnp.sign(q) * jnp.floor(jnp.abs(q) + 0.5)
    return qr * s + beta


if __name__ == "__main__":
    key = jax.random.PRNGKey(0)
    x = jax.random.normal(key, (2, 4, 16, 16), dtype=jnp.float32)  # NCHW

    quantizer = LSQPlusActivationQuantizer(a_bits=8, all_positive=False,
                                           batch_init=20)
    quantizer.training = True  # exercises the batch-init (min/max) path

    q_a = quantizer(x)
    q_a = jax.block_until_ready(q_a)

    # sanity check against a pure-JAX reference of the same forward math
    ref = _reference_forward(x, quantizer.s, quantizer.beta,
                             quantizer.Qn, quantizer.Qp)
    assert q_a.shape == x.shape and q_a.dtype == x.dtype
    assert bool(jnp.allclose(q_a, ref, rtol=1e-5, atol=1e-5))

    # check the batch-init min/max reduction against jnp
    mn, mx = minmax_pallas(x)
    assert bool(jnp.allclose(mn, jnp.min(x), rtol=1e-6, atol=1e-6))
    assert bool(jnp.allclose(mx, jnp.max(x), rtol=1e-6, atol=1e-6))

    # second call exercises the EMA branch and the unaligned-shape path
    x2 = jax.random.normal(jax.random.PRNGKey(1), (2, 3, 7, 5),
                           dtype=jnp.float32)
    q2 = jax.block_until_ready(quantizer(x2))
    ref2 = _reference_forward(x2, quantizer.s, quantizer.beta,
                              quantizer.Qn, quantizer.Qp)
    assert q2.shape == x2.shape
    assert bool(jnp.allclose(q2, ref2, rtol=1e-5, atol=1e-5))

    mn2, mx2 = minmax_pallas(x2)
    assert bool(jnp.allclose(mn2, jnp.min(x2), rtol=1e-6, atol=1e-6))
    assert bool(jnp.allclose(mx2, jnp.max(x2), rtol=1e-6, atol=1e-6))

    # post-init (inference-style) quantize path
    quantizer.training = False
    q3 = jax.block_until_ready(quantizer(x))
    ref3 = _reference_forward(x, quantizer.s, quantizer.beta,
                              quantizer.Qn, quantizer.Qp)
    assert bool(jnp.allclose(q3, ref3, rtol=1e-5, atol=1e-5))

    print("KERNEL_OK")
</pallas_src>

<mosaic_0001>
module attributes {stable_mosaic.version = 11 : i64} {
  func.func @_minmax_kernel(%arg0: i32, %arg1: i32, %arg2: memref<16x128xf32, #tpu.memory_space<vmem>>, %arg3: memref<8x128xf32, #tpu.memory_space<vmem>>, %arg4: memref<8x128xf32, #tpu.memory_space<vmem>>) attributes {dimension_semantics = [#tpu.dimension_semantics<parallel>, #tpu.dimension_semantics<arbitrary>], iteration_bounds = array<i64: 2, 1>, scalar_prefetch = 0 : i64, scratch_operands = 0 : i64, tpu.core_type = #tpu.core_type<tc>, window_params = [{transform_indices = @transform_0, window_bounds = array<i64: 16, 128>}, {transform_indices = @transform_1, window_bounds = array<i64: 8, 128>}, {transform_indices = @transform_2, window_bounds = array<i64: 8, 128>}]} {
    %c0_i32 = arith.constant 0 : i32
    %0 = arith.cmpi eq, %arg1, %c0_i32 : i32
    %1 = arith.extui %0 : i1 to i32
    %c0_i32_0 = arith.constant 0 : i32
    %2 = arith.cmpi ne, %1, %c0_i32_0 : i32
    scf.if %2 {
      %cst_11 = arith.constant 0x7F800000 : f32
      %14 = vector.broadcast %cst_11 : f32 to vector<8x128xf32>
      %c0_12 = arith.constant 0 : index
      %c0_13 = arith.constant 0 : index
      %15 = vector.load %arg3[%c0_12, %c0_13] : memref<8x128xf32, #tpu.memory_space<vmem>>, vector<8x128xf32>
      tpu.vector_store %arg3[%c0_12, %c0_13], %14 {strides = array<i32>} : memref<8x128xf32, #tpu.memory_space<vmem>>, vector<8x128xf32>,
      %cst_14 = arith.constant 0xFF800000 : f32
      %16 = vector.broadcast %cst_14 : f32 to vector<8x128xf32>
      %c0_15 = arith.constant 0 : index
      %c0_16 = arith.constant 0 : index
      %17 = vector.load %arg4[%c0_15, %c0_16] : memref<8x128xf32, #tpu.memory_space<vmem>>, vector<8x128xf32>
      tpu.vector_store %arg4[%c0_15, %c0_16], %16 {strides = array<i32>} : memref<8x128xf32, #tpu.memory_space<vmem>>, vector<8x128xf32>,
    } else {
    }
    %c0 = arith.constant 0 : index
    %c0_1 = arith.constant 0 : index
    %3 = vector.load %arg2[%c0, %c0_1] : memref<16x128xf32, #tpu.memory_space<vmem>>, vector<16x128xf32>
    %4 = vector.shape_cast %3 : vector<16x128xf32> to vector<2x8x128xf32>
    %cst = arith.constant dense<0x7F800000> : vector<8x128xf32>
    %5 = vector.multi_reduction <minimumf>, %4, %cst [0] : vector<2x8x128xf32> to vector<8x128xf32>
    %6 = vector.shape_cast %3 : vector<16x128xf32> to vector<2x8x128xf32>
    %cst_2 = arith.constant dense<0xFF800000> : vector<8x128xf32>
    %7 = vector.multi_reduction <maximumf>, %6, %cst_2 [0] : vector<2x8x128xf32> to vector<8x128xf32>
    %c0_3 = arith.constant 0 : index
    %c0_4 = arith.constant 0 : index
    %8 = vector.load %arg3[%c0_3, %c0_4] : memref<8x128xf32, #tpu.memory_space<vmem>>, vector<8x128xf32>
    %9 = arith.minimumf %8, %5 : vector<8x128xf32>
    %c0_5 = arith.constant 0 : index
    %c0_6 = arith.constant 0 : index
    %10 = vector.load %arg3[%c0_5, %c0_6] : memref<8x128xf32, #tpu.memory_space<vmem>>, vector<8x128xf32>
    tpu.vector_store %arg3[%c0_5, %c0_6], %9 {strides = array<i32>} : memref<8x128xf32, #tpu.memory_space<vmem>>, vector<8x128xf32>,
    %c0_7 = arith.constant 0 : index
    %c0_8 = arith.constant 0 : index
    %11 = vector.load %arg4[%c0_7, %c0_8] : memref<8x128xf32, #tpu.memory_space<vmem>>, vector<8x128xf32>
    %12 = arith.maximumf %11, %7 : vector<8x128xf32>
    %c0_9 = arith.constant 0 : index
    %c0_10 = arith.constant 0 : index
    %13 = vector.load %arg4[%c0_9, %c0_10] : memref<8x128xf32, #tpu.memory_space<vmem>>, vector<8x128xf32>
    tpu.vector_store %arg4[%c0_9, %c0_10], %12 {strides = array<i32>} : memref<8x128xf32, #tpu.memory_space<vmem>>, vector<8x128xf32>,
    return
  }
  func.func @transform_0(%arg0: i32, %arg1: i32) -> (i32, i32) {
    %c1_i32 = arith.constant 1 : i32
    %0 = arith.muli %arg0, %c1_i32 : i32
    %1 = arith.addi %0, %arg1 : i32
    %c0_i32 = arith.constant 0 : i32
    %2 = arith.minsi %1, %c0_i32 : i32
    %c0_i32_0 = arith.constant 0 : i32
    %c0_i32_1 = arith.constant 0 : i32
    return %2, %c0_i32_0 : i32, i32
  }
  func.func @transform_1(%arg0: i32, %arg1: i32) -> (i32, i32) {
    %c0_i32 = arith.constant 0 : i32
    %c0_i32_0 = arith.constant 0 : i32
    return %arg0, %c0_i32 : i32, i32
  }
  func.func @transform_2(%arg0: i32, %arg1: i32) -> (i32, i32) {
    %c0_i32 = arith.constant 0 : i32
    %c0_i32_0 = arith.constant 0 : i32
    return %arg0, %c0_i32 : i32, i32
  }
}

module attributes {stable_mosaic.version = 11 : i64} {
  func.func @_lsq_quant_kernel(%arg0: i32, %arg1: memref<3xf32, #tpu.memory_space<smem>>, %arg2: memref<16x128xf32, #tpu.memory_space<vmem>>, %arg3: memref<16x128xf32, #tpu.memory_space<vmem>>) attributes {dimension_semantics = [#tpu.dimension_semantics<parallel>], iteration_bounds = array<i64: 1>, scalar_prefetch = 0 : i64, scratch_operands = 0 : i64, tpu.core_type = #tpu.core_type<tc>, window_params = [{transform_indices = @transform_0, window_bounds = array<i64: 3>}, {transform_indices = @transform_1, window_bounds = array<i64: 16, 128>}, {transform_indices = @transform_2, window_bounds = array<i64: 16, 128>}]} {
    %c0 = arith.constant 0 : index
    %0 = memref.load %arg1[%c0] : memref<3xf32, #tpu.memory_space<smem>>
    %c1 = arith.constant 1 : index
    %1 = memref.load %arg1[%c1] : memref<3xf32, #tpu.memory_space<smem>>
    %c2 = arith.constant 2 : index
    %2 = memref.load %arg1[%c2] : memref<3xf32, #tpu.memory_space<smem>>
    %c0_0 = arith.constant 0 : index
    %c0_1 = arith.constant 0 : index
    %3 = vector.load %arg2[%c0_0, %c0_1] : memref<16x128xf32, #tpu.memory_space<vmem>>, vector<16x128xf32>
    %4 = vector.broadcast %2 : f32 to vector<16x128xf32>
    %5 = arith.subf %3, %4 : vector<16x128xf32>
    %6 = vector.broadcast %1 : f32 to vector<16x128xf32>
    %7 = arith.mulf %5, %6 : vector<16x128xf32>
    %cst = arith.constant -1.280000e+02 : f32
    %cst_2 = arith.constant 1.270000e+02 : f32
    %8 = vector.broadcast %cst : f32 to vector<16x128xf32>
    %9 = arith.maximumf %8, %7 : vector<16x128xf32>
    %10 = vector.broadcast %cst_2 : f32 to vector<16x128xf32>
    %11 = arith.minimumf %10, %9 : vector<16x128xf32>
    %cst_3 = arith.constant 0.000000e+00 : f32
    %12 = vector.broadcast %cst_3 : f32 to vector<16x128xf32>
    %13 = arith.cmpf oge, %11, %12 : vector<16x128xf32>
    %cst_4 = arith.constant 5.000000e-01 : f32
    %14 = vector.broadcast %cst_4 : f32 to vector<16x128xf32>
    %15 = arith.addf %11, %14 : vector<16x128xf32>
    %16 = math.floor %15 : vector<16x128xf32>
    %cst_5 = arith.constant 5.000000e-01 : f32
    %17 = vector.broadcast %cst_5 : f32 to vector<16x128xf32>
    %18 = arith.subf %11, %17 : vector<16x128xf32>
    %19 = math.ceil %18 : vector<16x128xf32>
    %20 = arith.select %13, %16, %19 : vector<16x128xi1>, vector<16x128xf32>
    %21 = vector.broadcast %0 : f32 to vector<16x128xf32>
    %22 = arith.mulf %20, %21 : vector<16x128xf32>
    %23 = vector.broadcast %2 : f32 to vector<16x128xf32>
    %24 = arith.addf %22, %23 : vector<16x128xf32>
    %c0_6 = arith.constant 0 : index
    %c0_7 = arith.constant 0 : index
    %25 = vector.load %arg3[%c0_6, %c0_7] : memref<16x128xf32, #tpu.memory_space<vmem>>, vector<16x128xf32>
    tpu.vector_store %arg3[%c0_6, %c0_7], %24 {strides = array<i32>} : memref<16x128xf32, #tpu.memory_space<vmem>>, vector<16x128xf32>,
    return
  }
  func.func @transform_0(%arg0: i32) -> i32 {
    %c0_i32 = arith.constant 0 : i32
    %c0_i32_0 = arith.constant 0 : i32
    return %c0_i32 : i32
  }
  func.func @transform_1(%arg0: i32) -> (i32, i32) {
    %c0_i32 = arith.constant 0 : i32
    %c0_i32_0 = arith.constant 0 : i32
    return %arg0, %c0_i32 : i32, i32
  }
  func.func @transform_2(%arg0: i32) -> (i32, i32) {
    %c0_i32 = arith.constant 0 : i32
    %c0_i32_0 = arith.constant 0 : i32
    return %arg0, %c0_i32 : i32, i32
  }
}

</mosaic_0001>

<bundles_post_ra>
// kernel: lsqplus_init_and_quantize.3
= control target key start
LH: loop header
LB: loop body
LE: loop exit
PB: predicated region body
PF: predicated region fallthrough
CT: control target
= control target key end

     0   :  { %7 = vsyncpa [#allocation3], 0  ;;  %s113_s0 = inlined_call_operand.vmem [shape: f32[3], index: 0, kind: input, shape index: {}]   ;;  %s114_s1 = inlined_call_operand.vmem [shape: f32[16,128], index: 1, kind: input, shape index: {}]   ;;  %s115_s2 = inlined_call_operand.vmem [shape: f32[16,128], index: 2, kind: output, shape index: {}]  }
   0x1   :  { %s14_s11 = sshll.u32 %s113_s0, 4  ;;  %s15_s11 = int_to_ptr.vmem [resolvable:$true] %s14_s11 }
   0x2   :  { %s68_s12 = scalar_lea.vmem %s15_s11, 16  ;;  %p73_p1 = scmp.lt.s32.totalorder %s15_s11, %s15_s11 }
   0x3   :  { %p69_p0 = scmp.ne.s32.totalorder %s15_s11, %s68_s12  ;;  %p74_p2 = scmp.lt.s32.totalorder %s68_s12, %s68_s12 }
   0x5   :  { %p75_p3 = por %p74_p2, %p73_p1 }
   0x7   :  { %p76_p4 = pnand %p75_p3, %p69_p0 }
   0x9   :  { %79 = shalt.err (!%p76_p4)
}
   0xa   :  { %s82_s13 = smov [#allocation2]  }
   0xb   :  { %17 = dma.vmem_to_smem %s15_s11, 16, %s82_s13, [#allocation3]  }
   0xc   :  { %80 = dma.done.wait [#allocation3], 16  }
   0xd   :  { %81 = vsyncadd [#allocation3], 4294967280 }
   0xe   :  { %23 = sfence }
   0xf   :  { %s63_s14 = sld [smem:[#allocation2 + $0x1]]  ;;  %v27_v0 = vld [vmem:[%s114_s1] sm:$0xff]  ;;  %v28_v1 = vld [vmem:[%s114_s1 + $0x8] sm:$0xff] }
  0x10   :  { %s64_s15 = sld [smem:[#allocation2 + $0x2]] }
  0x11   :  { %s24_s19 = sld [smem:[#allocation2]] }
  0x15   :  { %v32_v3 = vstv %s63_s14 }
  0x16   :  { %v29_v2 = vstv %s64_s15 }
  0x17   :  { %v30_v4 = vsub.f32 %v27_v0, %v29_v2  ;;  %v31_v5 = vsub.f32 %v28_v1, %v29_v2  ;;  %v51_v18 = vstv %s24_s19 }
  0x19   :  { %v33_v6 = vmul.f32 %v32_v3, %v30_v4  ;;  %v34_v7 = vmul.f32 %v32_v3, %v31_v5 }
  0x1b   :  { %v35_v8 = vmax.f32 %v33_v6, -128.0  ;;  %v36_v9 = vmax.f32 %v34_v7, -128.0 }
  0x1d   :  { %v37_v10 = vmin.f32 %v35_v8, 127.0  ;;  %v38_v11 = vmin.f32 %v36_v9, 127.0 }
  0x1f   :  { %v41_v12 = vadd.f32 0.5, %v37_v10  ;;  %v65_v13 = vadd.f32 -0.5, %v37_v10  ;;  %vm39_vm0 = vcmp.ge.f32.partialorder %v37_v10, 0.0  ;;  %v42_v14 = vadd.f32 0.5, %v38_v11 }
  0x20   :  { %v66_v15 = vadd.f32 -0.5, %v38_v11  ;;  %vm40_vm1 = vcmp.ge.f32.partialorder %v38_v11, 0.0 }
  0x21   :  { %v43_v16 = vfloor.f32 %v41_v12  ;;  %v47_v17 = vceil.f32 %v65_v13  ;;  %v44_v19 = vfloor.f32 %v42_v14 }
  0x22   :  { %v48_v20 = vceil.f32 %v66_v15 }
  0x23   :  { %v49_v21 = vsel %vm39_vm0, %v43_v16, %v47_v17 }
  0x24   :  { %v52_v22 = vmul.f32 %v51_v18, %v49_v21  ;;  %v50_v23 = vsel %vm40_vm1, %v44_v19, %v48_v20 }
  0x25   :  { %v53_v24 = vmul.f32 %v51_v18, %v50_v23 }
  0x26   :  { %v54_v25 = vadd.f32 %v52_v22, %v29_v2 }
  0x27   :  { %v55_v26 = vadd.f32 %v53_v24, %v29_v2 }
  0x28   :  { %56 = vst [vmem:[%s115_s2] sm:$0xff] %v54_v25 }
  0x29   :  { %57 = vst [vmem:[%s115_s2 + $0x8] sm:$0xff] %v55_v26 }
  0x2a   :  { %62 = vsyncpa [#allocation3], 1 }

// kernel: lsqplus_init_and_quantize.2
= control target key start
LH: loop header
LB: loop body
LE: loop exit
PB: predicated region body
PF: predicated region fallthrough
CT: control target
= control target key end

     0   :  { %s372_s9 = smov 0   ;;  %s374_s10 = smov 0   ;;  %s405_s0 = inlined_call_operand.vmem [shape: f32[16,128], index: 0, kind: input, shape index: {}]   ;;  %s406_s1 = inlined_call_operand.vmem [shape: f32[16,128], index: 1, kind: output, shape index: {0}]   ;;  %s407_s2 = inlined_call_operand.vmem [shape: f32[16,128], index: 2, kind: output, shape index: {1}]  }
   0x1   :  { %s376_s11 = smov 0  }
   0x2 LB: > { %s25_s12 = sadd.s32 1, %s351_s10  ;;  %p300_p0 = scmp.ge.s32.totalorder %s355_s11, 1  ;;  %s355_s11 = sphi %s376_s11, %s13_s11   ;;  %s351_s10 = sphi %s374_s10, %s409_s10   ;;  %s347_s9 = sphi %s372_s9, %s408_s9  }
   0x3   : > { %p27_p1 = scmp.ge.s32.totalorder %s25_s12, 2  ;;  %p140_p2 = scmp.lt.s32.totalorder %s355_s11, 3 }
   0x5   : > { %s411_s12 = smov (%p27_p1, %s25_s12), 0  ;;  %p141_p3 = pnand %p300_p0, %p140_p2 }
   0x6   : > { %p169_p4 = scmp.lt.s32.totalorder (!%p141_p3), %s347_s9, 0  ;;  %p180_p5 = scmp.lt.s32.totalorder (!%p141_p3), %s347_s9, 1 }
   0x7   : > { %144 = sbr.rel (%p141_p3) target bundleno = 24 (0x18), region = 24 }
   0xc   : > { %s170_s13 = scalar_select %p169_p4, %s347_s9, 0 }
   0xd   : > { %s413_s9 = smov (!%p180_p5, %s347_s9), 1 }
   0xe   : > { %s301_s14 = sshll.u32 %s170_s13, 1  ;;  %s303_s16 = sshll.u32 %s413_s9, 3 }
   0xf   : > { %p172_p6 = scmp.lt.s32.totalorder %s301_s14, 1  ;;  %s183_s22 = scalar_lea.vmem %s406_s1, %s303_s16 }
  0x10   : > { %s187_s25 = scalar_lea.vmem %s407_s2, %s303_s16 }
  0x11   : > { %s415_s14 = smov (!%p172_p6, %s301_s14), 1 }
  0x12   : > { %s302_s15 = sshll.u32 %s415_s14, 3 }
  0x13   : > { %s175_s19 = scalar_lea.vmem %s405_s0, %s302_s15 }
  0x14   : > { %v194_v0 = vld [vmem:[%s175_s19] sm:$0xff]  ;;  %v195_v1 = vld [vmem:[%s175_s19 + $0x8] sm:$0xff] }
  0x15   : > { %v196_v2 = vmin.f32 %v194_v0, %v195_v1  ;;  %v197_v3 = vmax.f32 %v194_v0, %v195_v1 }
  0x17   : > { %200 = vst [vmem:[%s183_s22] sm:$0xff] %v196_v2  ;;  %203 = vst [vmem:[%s187_s25] sm:$0xff] %v197_v3 }
  0x18 PF: > { %s13_s11 = sadd.s32 1, %s355_s11   ;;  %s408_s9 = smov %s351_s10 }
  0x19   : > { %p10_p7 = scmp.ge.s32.totalorder %s13_s11, 4   ;;  %s409_s10 = smov %s411_s12 }
  0x1b   :  { %12 = sbr.rel (!%p10_p7) target bundleno = 2 (0x2), region = 70 }

</bundles_post_ra>
